<compile_context>
chip_gen: v7x
topology: tpu7x:2x2x1
jax: 0.10.0
libtpu: 0.0.40
codegen_flags: <defaults>
</compile_context>

<pallas_src>
import jax
import jax.numpy as jnp
from jax.experimental import pallas as pl
from jax.experimental.pallas import tpu as pltpu


def _round_up(n, m):
    return ((n + m - 1) // m) * m


# ----------------------------- kernel bodies ------------------------------ #
def _beta_head_compute(pos_ref, neg_ref, w_ref, b_ref):
    # Subtract in f32 (inputs are f32 refs), then cast only the MXU operand
    # to W's dtype (bf16 feed when W was prepared in bf16, no-op for f32).
    diff = (pos_ref[...] - neg_ref[...]).astype(w_ref.dtype)
    logits = jnp.dot(diff, w_ref[...], preferred_element_type=jnp.float32)
    logits = logits + b_ref[...].astype(jnp.float32)
    # Numerically stable softplus: log(1+exp(x)) = max(x,0) + log1p(exp(-|x|)).
    sp = jnp.maximum(logits, 0.0) + jnp.log1p(jnp.exp(-jnp.abs(logits)))
    return sp + 1e-4


def beta_head_kernel_split(pos_ref, neg_ref, w_ref, b_ref, alpha_ref, beta_ref):
    out = _beta_head_compute(pos_ref, neg_ref, w_ref, b_ref)
    d = alpha_ref.shape[-1]                       # lane-aligned split (D % 128 == 0)
    alpha_ref[...] = out[:, :d].astype(alpha_ref.dtype)
    beta_ref[...] = out[:, d:].astype(beta_ref.dtype)


def beta_head_kernel_slab(pos_ref, neg_ref, w_ref, b_ref, o_ref):
    o_ref[...] = _beta_head_compute(pos_ref, neg_ref, w_ref, b_ref).astype(o_ref.dtype)


# ------------------------------ wrapper ----------------------------------- #
def beta_head_forward(pos_out, neg_out, params, *, block_batch=1024,
                      out_dtype=jnp.float32):
    """pos_out/neg_out: (batch, D) float32.
    params: {"w": (D, 2D) pre-transposed weight (f32 or bf16), "b": (1, 2D) f32}.
    Returns (alpha, beta), each (batch, D) in out_dtype."""
    batch, dim = pos_out.shape
    w, b = params["w"], params["b"]
    out_dim = w.shape[1]
    assert out_dim == 2 * dim and b.shape == (1, out_dim)

    # bf16 MXU operands pack 16 rows per vreg; keep the batch tile 16-aligned.
    align = 16 if w.dtype == jnp.bfloat16 else 8
    tb = min(_round_up(block_batch, align), _round_up(batch, align))
    # v7x megacore: keep >= 2 grid steps for batches big enough to split, so
    # the "parallel" batch axis can be sharded across both TensorCores.
    if pl.cdiv(batch, tb) < 2 and batch > 2 * align:
        tb = _round_up(pl.cdiv(batch, 2), align)
    grid = (pl.cdiv(batch, tb),)          # ragged last block clipped; no jnp.pad

    # Explicit scoped-VMEM budget (double-buffered tiles + resident W/b).
    w_itemsize = jnp.dtype(w.dtype).itemsize
    o_itemsize = jnp.dtype(out_dtype).itemsize
    vmem_est = (2 * 2 * tb * dim * 4                 # pos + neg tiles (f32)
                + 2 * dim * out_dim * w_itemsize     # W (constant index -> fetched once)
                + 2 * out_dim * 4                    # bias
                + 2 * tb * out_dim * o_itemsize)     # output tile(s)
    vmem_limit = int(max(4 << 20, min(64 << 20, 2 * vmem_est)))

    act_spec = pl.BlockSpec((tb, dim), lambda i: (i, 0))
    w_spec = pl.BlockSpec((dim, out_dim), lambda i: (0, 0))   # VMEM-resident
    b_spec = pl.BlockSpec((1, out_dim), lambda i: (0, 0))

    compiler_params = pltpu.CompilerParams(
        dimension_semantics=("parallel",),
        vmem_limit_bytes=vmem_limit)

    if dim % 128 == 0:
        # Lane-dense split outputs: alpha / beta written directly from the
        # kernel, no wrapper slicing pass over the output.
        alpha, beta = pl.pallas_call(
            beta_head_kernel_split,
            out_shape=(jax.ShapeDtypeStruct((batch, dim), out_dtype),
                       jax.ShapeDtypeStruct((batch, dim), out_dtype)),
            grid_spec=pltpu.PrefetchScalarGridSpec(
                num_scalar_prefetch=0,
                grid=grid,
                in_specs=[act_spec, act_spec, w_spec, b_spec],
                out_specs=(pl.BlockSpec((tb, dim), lambda i: (i, 0)),
                           pl.BlockSpec((tb, dim), lambda i: (i, 0))),
            ),
            compiler_params=compiler_params,
        )(pos_out, neg_out, w, b)
        return alpha, beta

    # D not a multiple of 128: emit one lane-dense (batch, 2D) slab (avoids
    # masked sub-128 partial stores) and split in the wrapper (tiny at this D).
    slab = pl.pallas_call(
        beta_head_kernel_slab,
        out_shape=jax.ShapeDtypeStruct((batch, out_dim), out_dtype),
        grid_spec=pltpu.PrefetchScalarGridSpec(
            num_scalar_prefetch=0,
            grid=grid,
            in_specs=[act_spec, act_spec, w_spec, b_spec],
            out_specs=pl.BlockSpec((tb, out_dim), lambda i: (i, 0)),
        ),
        compiler_params=compiler_params,
    )(pos_out, neg_out, w, b)
    return slab[:, :dim], slab[:, dim:]


# -------------------------- parameter handling ----------------------------- #
def init_params(key, output_dim):
    """Matches PyTorch nn.Linear(output_dim, 2*output_dim) default init,
    weight stored pre-transposed as (in, out), float32."""
    bound = 1.0 / jnp.sqrt(output_dim)
    k_w, k_b = jax.random.split(key)
    w = jax.random.uniform(k_w, (output_dim, 2 * output_dim),
                           minval=-bound, maxval=bound, dtype=jnp.float32)
    b = jax.random.uniform(k_b, (1, 2 * output_dim),
                           minval=-bound, maxval=bound, dtype=jnp.float32)
    return {"w": w, "b": b}


def prepare_params(params, mxu_dtype=jnp.bfloat16):
    """One-time (off the hot path) cast of W to the MXU feed dtype; the bias
    stays f32 for the epilogue.  Halves weight HBM/VMEM bytes."""
    return {"w": params["w"].astype(mxu_dtype), "b": params["b"]}


# -------------------------- pure-JAX reference ----------------------------- #
def reference_forward(pos_out, neg_out, params):
    diff = pos_out - neg_out
    ab = diff @ params["w"] + params["b"]
    half = ab.shape[-1] // 2
    alpha = jax.nn.softplus(ab[:, :half]) + 1e-4
    beta = jax.nn.softplus(ab[:, half:]) + 1e-4
    return alpha, beta


# --------------------------------- main ------------------------------------ #
if __name__ == "__main__":
    # NOTE: at this demo scale the op touches only a few hundred KB, so a
    # standalone pallas_call is launch/DMA dominated; in production this head
    # would be fused into the backbone's final layer.  Shapes kept small here.
    key = jax.random.PRNGKey(0)

    # --- Case 1: D = 128 (lane-dense split outputs, batch-tiled grid) -------
    batch, dim = 48, 128
    k1, k2, k3, key = jax.random.split(key, 4)
    pos = jax.random.normal(k1, (batch, dim), dtype=jnp.float32)
    neg = jax.random.normal(k2, (batch, dim), dtype=jnp.float32)
    params = init_params(k3, dim)
    alpha_ref, beta_ref = reference_forward(pos, neg, params)

    # f32 weights: tight check.
    a32, b32 = beta_head_forward(pos, neg, params)
    jax.block_until_ready((a32, b32))
    assert a32.shape == (batch, dim) and b32.shape == (batch, dim)
    assert jnp.allclose(a32, alpha_ref, atol=1e-5, rtol=1e-5)
    assert jnp.allclose(b32, beta_ref, atol=1e-5, rtol=1e-5)
    assert bool(jnp.all(a32 > 0.0)) and bool(jnp.all(b32 > 0.0))

    # bf16 weights (pre-cast once; MXU-native feed, half the weight bytes).
    params_bf16 = prepare_params(params)
    a16, b16 = beta_head_forward(pos, neg, params_bf16)
    jax.block_until_ready((a16, b16))
    assert jnp.allclose(a16, alpha_ref, atol=3e-2, rtol=3e-2)
    assert jnp.allclose(b16, beta_ref, atol=3e-2, rtol=3e-2)
    assert bool(jnp.all(a16 > 0.0)) and bool(jnp.all(b16 > 0.0))

    # --- Case 2: D = 64 (< 128 lanes -> single 2D-wide slab path) -----------
    batch2, dim2 = 8, 64
    k1, k2, k3, key = jax.random.split(key, 4)
    pos2 = jax.random.normal(k1, (batch2, dim2), dtype=jnp.float32)
    neg2 = jax.random.normal(k2, (batch2, dim2), dtype=jnp.float32)
    params2 = init_params(k3, dim2)
    a2_ref, b2_ref = reference_forward(pos2, neg2, params2)

    a2, b2 = beta_head_forward(pos2, neg2, params2)
    jax.block_until_ready((a2, b2))
    assert a2.shape == (batch2, dim2) and b2.shape == (batch2, dim2)
    assert jnp.allclose(a2, a2_ref, atol=1e-5, rtol=1e-5)
    assert jnp.allclose(b2, b2_ref, atol=1e-5, rtol=1e-5)

    print("KERNEL_OK")
</pallas_src>

<mosaic_0001>
module attributes {stable_mosaic.version = 11 : i64} {
  func.func @beta_head_kernel_split(%arg0: i32, %arg1: memref<24x128xf32, #tpu.memory_space<vmem>>, %arg2: memref<24x128xf32, #tpu.memory_space<vmem>>, %arg3: memref<128x256xf32, #tpu.memory_space<vmem>>, %arg4: memref<1x256xf32, #tpu.memory_space<vmem>>, %arg5: memref<24x128xf32, #tpu.memory_space<vmem>>, %arg6: memref<24x128xf32, #tpu.memory_space<vmem>>) attributes {dimension_semantics = [#tpu.dimension_semantics<parallel>], iteration_bounds = array<i64: 2>, scalar_prefetch = 0 : i64, scratch_operands = 0 : i64, tpu.core_type = #tpu.core_type<tc>, window_params = [{transform_indices = @transform_0, window_bounds = array<i64: 24, 128>}, {transform_indices = @transform_1, window_bounds = array<i64: 24, 128>}, {pipeline_mode = #tpu.pipeline_mode<synchronous>, transform_indices = @transform_2, window_bounds = array<i64: 128, 256>}, {pipeline_mode = #tpu.pipeline_mode<synchronous>, transform_indices = @transform_3, window_bounds = array<i64: 1, 256>}, {transform_indices = @transform_4, window_bounds = array<i64: 24, 128>}, {transform_indices = @transform_5, window_bounds = array<i64: 24, 128>}]} {
    %c0 = arith.constant 0 : index
    %c0_0 = arith.constant 0 : index
    %0 = vector.load %arg1[%c0, %c0_0] : memref<24x128xf32, #tpu.memory_space<vmem>>, vector<24x128xf32>
    %c0_1 = arith.constant 0 : index
    %c0_2 = arith.constant 0 : index
    %1 = vector.load %arg2[%c0_1, %c0_2] : memref<24x128xf32, #tpu.memory_space<vmem>>, vector<24x128xf32>
    %2 = arith.subf %0, %1 : vector<24x128xf32>
    %c0_3 = arith.constant 0 : index
    %c0_4 = arith.constant 0 : index
    %3 = vector.load %arg3[%c0_3, %c0_4] : memref<128x256xf32, #tpu.memory_space<vmem>>, vector<128x256xf32>
    %cst = arith.constant dense<0.000000e+00> : vector<24x256xf32>
    %4 = tpu.matmul %2, %3, %cst {dimension_numbers = #tpu.dot_dimension_numbers<[1], [0], [0], [1], [0, 0, 1, 1], [], []>} : vector<24x128xf32>, vector<128x256xf32>, vector<24x256xf32> -> vector<24x256xf32>
    %c0_5 = arith.constant 0 : index
    %c0_6 = arith.constant 0 : index
    %5 = vector.load %arg4[%c0_5, %c0_6] : memref<1x256xf32, #tpu.memory_space<vmem>>, vector<1x256xf32>
    %6 = vector.broadcast %5 : vector<1x256xf32> to vector<24x256xf32>
    %7 = arith.addf %4, %6 : vector<24x256xf32>
    %cst_7 = arith.constant 0.000000e+00 : f32
    %8 = vector.broadcast %cst_7 : f32 to vector<24x256xf32>
    %9 = arith.maximumf %7, %8 : vector<24x256xf32>
    %10 = math.absf %7 : vector<24x256xf32>
    %cst_8 = arith.constant 0.000000e+00 : f32
    %11 = vector.broadcast %cst_8 : f32 to vector<24x256xf32>
    %12 = arith.subf %11, %10 : vector<24x256xf32>
    %13 = math.exp %12 : vector<24x256xf32>
    %14 = math.log1p %13 : vector<24x256xf32>
    %15 = arith.addf %9, %14 : vector<24x256xf32>
    %cst_9 = arith.constant 9.99999974E-5 : f32
    %16 = vector.broadcast %cst_9 : f32 to vector<24x256xf32>
    %17 = arith.addf %15, %16 : vector<24x256xf32>
    %18 = vector.extract_strided_slice %17 {offsets = [0, 0], sizes = [24, 128], strides = [1, 1]} : vector<24x256xf32> to vector<24x128xf32>
    %c0_10 = arith.constant 0 : index
    %c0_11 = arith.constant 0 : index
    %19 = vector.load %arg5[%c0_10, %c0_11] : memref<24x128xf32, #tpu.memory_space<vmem>>, vector<24x128xf32>
    tpu.vector_store %arg5[%c0_10, %c0_11], %18 {strides = array<i32>} : memref<24x128xf32, #tpu.memory_space<vmem>>, vector<24x128xf32>,
    %20 = vector.extract_strided_slice %17 {offsets = [0, 128], sizes = [24, 128], strides = [1, 1]} : vector<24x256xf32> to vector<24x128xf32>
    %c0_12 = arith.constant 0 : index
    %c0_13 = arith.constant 0 : index
    %21 = vector.load %arg6[%c0_12, %c0_13] : memref<24x128xf32, #tpu.memory_space<vmem>>, vector<24x128xf32>
    tpu.vector_store %arg6[%c0_12, %c0_13], %20 {strides = array<i32>} : memref<24x128xf32, #tpu.memory_space<vmem>>, vector<24x128xf32>,
    return
  }
  func.func @transform_0(%arg0: i32) -> (i32, i32) {
    %c0_i32 = arith.constant 0 : i32
    %c0_i32_0 = arith.constant 0 : i32
    return %arg0, %c0_i32 : i32, i32
  }
  func.func @transform_1(%arg0: i32) -> (i32, i32) {
    %c0_i32 = arith.constant 0 : i32
    %c0_i32_0 = arith.constant 0 : i32
    return %arg0, %c0_i32 : i32, i32
  }
  func.func @transform_2(%arg0: i32) -> (i32, i32) {
    %c0_i32 = arith.constant 0 : i32
    %c0_i32_0 = arith.constant 0 : i32
    %c0_i32_1 = arith.constant 0 : i32
    return %c0_i32, %c0_i32_0 : i32, i32
  }
  func.func @transform_3(%arg0: i32) -> (i32, i32) {
    %c0_i32 = arith.constant 0 : i32
    %c0_i32_0 = arith.constant 0 : i32
    %c0_i32_1 = arith.constant 0 : i32
    return %c0_i32, %c0_i32_0 : i32, i32
  }
  func.func @transform_4(%arg0: i32) -> (i32, i32) {
    %c0_i32 = arith.constant 0 : i32
    %c0_i32_0 = arith.constant 0 : i32
    return %arg0, %c0_i32 : i32, i32
  }
  func.func @transform_5(%arg0: i32) -> (i32, i32) {
    %c0_i32 = arith.constant 0 : i32
    %c0_i32_0 = arith.constant 0 : i32
    return %arg0, %c0_i32 : i32, i32
  }
}

</mosaic_0001>

<bundles_post_ra>
// kernel: tpu_custom_call.1
= control target key start
LH: loop header
LB: loop body
LE: loop exit
PB: predicated region body
PF: predicated region fallthrough
CT: control target
= control target key end

     0   :  { %s1504_s0 = inlined_call_operand.hbm [shape: f32[48,128], index: 0, kind: input, shape index: {}]   ;;  %s1505_s1 = inlined_call_operand.hbm [shape: f32[48,128], index: 1, kind: input, shape index: {}]   ;;  %s1506_s2 = inlined_call_operand.hbm [shape: f32[128,256], index: 2, kind: input, shape index: {}]   ;;  %s1507_s3 = inlined_call_operand.vmem [shape: f32[1,256], index: 3, kind: input, shape index: {}]   ;;  %s1508_s4 = inlined_call_operand.hbm [shape: f32[48,128], index: 4, kind: output, shape index: {0}]   ;;  %s1509_s5 = inlined_call_operand.hbm [shape: f32[48,128], index: 5, kind: output, shape index: {1}]  }
   0x1   :  { %1513 = sst [smem:[#allocation16_spill]] %s1504_s0 }
   0x2   :  { %1514 = sst [smem:[#allocation17_spill]] %s1506_s2 }
   0x3   :  { %11 = vsyncpa [#allocation3], 0 }
   0x4   :  { %13 = vsyncpa [#allocation3 + $0x1], 0 }
   0x5   :  { %14 = vsyncpa [#allocation6], 0 }
   0x6   :  { %16 = vsyncpa [#allocation6 + $0x1], 0 }
   0x7   :  { %17 = vsyncpa [#allocation4], 0 }
   0x8   :  { %19 = vsyncpa [#allocation4 + $0x1], 0 }
   0x9   :  { %20 = vsyncpa [#allocation10], 0 }
   0xa   :  { %22 = vsyncpa [#allocation10 + $0x1], 0  ;;  %s1125_s18 = smov 0   ;;  %s1127_s19 = smov 0  }
   0xb   :  { %s1129_s20 = smov 0   ;;  %s1131_s21 = smov 0  }
   0xc LB: > { %s1146_s22 = sadd.s32 4294967295, %s1081_s21   ;;  %s722_s23 = sadd.s32 4294967294, %s1081_s21   ;;  %s1081_s21 = sphi %s1131_s21, %s1539_s21   ;;  %s1077_s20 = sphi %s1129_s20, %s1538_s20   ;;  %s1073_s19 = sphi %s1127_s19, %s1537_s19   ;;  %s1069_s18 = sphi %s1125_s18, %s1536_s18  }
   0xd   : > { %p48_p0 = scmp.ne.s32.totalorder %s1073_s19, %s1069_s18  ;;  %p1510_p1 = scmp.eq.s32.totalorder %s1146_s22, 0 }
   0xe   : > { %p146_p3 = scmp.eq.s32.totalorder %s722_s23, 1  ;;  %p723_p5 = scmp.ge.s32.totalorder %s1081_s21, 1 }
   0xf   : > { %p1155_p4 = por %p1510_p1, %p48_p0  ;;  %p179_p7 = scmp.lt.s32.totalorder %s1081_s21, 3 }
  0x10   : > { %p1160_p6 = por %p146_p3, %p48_p0  ;;  %s1083_s27 = smov [#allocation7]  }
  0x11   : > { %s1515_s24 = scalar_select %p1155_p4, 1, 0 }
  0x12   : > { %s1516_s25 = scalar_select %p1160_p6, 1, 0 }
  0x13   : > { %p1165_p8 = pnand %p723_p5, %p179_p7  ;;  %s191_s28 = sshll.u32 %s1083_s27, 4  ;;  %s1169_s28 = int_to_ptr.vmem [resolvable:$true] %s191_s28 }
  0x14   : > { %s1181_s30 = sadd.s32 1, %s1081_s21   ;;  %s35_s6 = sadd.s32 1, %s1077_s20 }
  0x15   : > { %s1517_s26 = scalar_select %p1165_p8, 1, 0 }
  0x16   : > { %p801_p9 = pneg %p1165_p8  ;;  %s32_s7 = ssub.s32 %s1081_s21, %s1181_s30 }
  0x17   : > { %s1519_s2 = sld [smem:[#allocation17_spill]] }
  0x18   : > { %p1176_p11 = pnand %p801_p9, %p1510_p1 }
  0x1a   : > { %p889_p13 = pneg %p1176_p11 }
  0x1d   : > { %s887_s10 = scalar_lea.hbm %s1519_s2, 4096 }
  0x1e   : > { %p888_p12 = scmp.ne.s32.totalorder %s1519_s2, %s887_s10  ;;  %p894_p5 = scmp.lt.u32.totalorder %s887_s10, %s1519_s2 }
  0x20   : > { %p890_p0 = pnand %p889_p13, %p888_p12 }
  0x22   : > { %p891_p3 = pneg %p890_p0 }
  0x24   : > { %p896_p7 = pnand %p894_p5, %p891_p3 }
  0x26   : > { %899 = shalt.err (!%p896_p7)
}
  0x27   : > { %s900_s15 = scalar_lea.vmem %s1169_s28, 4096  ;;  %p908_p2 = scmp.lt.s32.totalorder %s1169_s28, %s1169_s28 }
  0x28   : > { %p901_p9 = scmp.ne.s32.totalorder %s1169_s28, %s900_s15  ;;  %p909_p6 = scmp.lt.s32.totalorder %s900_s15, %s900_s15 }
  0x2a   : > { %p903_p10 = pnand %p901_p9, %p889_p13  ;;  %p910_p4 = por %p909_p6, %p908_p2 }
  0x2c   : > { %p904_p1 = pneg %p903_p10 }
  0x2e   : > { %p911_p8 = pnand %p910_p4, %p904_p1 }
  0x30   : > { %914 = shalt.err (!%p911_p8)
}
  0x31   : > { %s1084_s16 = smov 256   ;;  %s1085_s17 = smov 16  }
  0x32   : > { %804 = dma.hbm_to_vmem [thread:$0]  (!%p1176_p11), %s1519_s2, 4096, %s1169_s28, [#allocation6], %s1084_s16, %s1084_s16, %s1085_s17  }
  0x33   : > { %p33_p1 = scmp.eq.s32.totalorder %s32_s7, 0  ;;  %p42_p2 = scmp.ne.s32.totalorder %s1077_s20, %s1073_s19 }
  0x34   : > { %p43_p4 = scmp.eq.s32.totalorder %s1081_s21, 0  ;;  %p820_p6 = scmp.lt.s32.totalorder %s1081_s21, 2 }
  0x35   : > { %s1212_s8 = scalar_select %p33_p1, %s1077_s20, %s35_s6  }
  0x36   : > { %p44_p8 = por %p43_p4, %p42_p2  ;;  %p1520_p10 = scmp.eq.s32.totalorder %s1146_s22, 1 }
  0x37   : > { %s208_s10 = sand.u32 1, %s1077_s20   ;;  %s734_s11 = smul.u32 384, %s1081_s21 }
  0x38   : > { %p1216_p12 = por %p1520_p10, %p42_p2  ;;  %s1222_s12 = smul.u32 24, %s208_s10 }
  0x39   : > { %s1522_s0 = sld [smem:[#allocation16_spill]]  ;;  %p1231_p11 = pnand %p820_p6, %p44_p8 }
  0x3a   : > { %s212_s7 = scalar_lea.vmem [#allocation2], %s1222_s12  ;;  %s1238_s15 = scalar_lea.sflag [#allocation3], %s208_s10 }
  0x3b   : > { %s219_s14 = sshll.u32 %s212_s7, 4  ;;  %p917_p0 = pneg %p1231_p11  ;;  %s1236_s14 = int_to_ptr.vmem [resolvable:$true] %s219_s14 }
  0x3f   : > { %s1229_s28 = scalar_lea.hbm %s1522_s0, %s734_s11  ;;  %s920_s27 = scalar_lea.hbm %s1522_s0, 768 }
  0x40   : > { %s915_s16 = scalar_lea.hbm %s1229_s28, 384  ;;  %p921_p7 = scmp.lt.u32.totalorder %s1229_s28, %s1522_s0 }
  0x41   : > { %p916_p13 = scmp.ne.s32.totalorder %s1229_s28, %s915_s16  ;;  %p922_p9 = scmp.lt.u32.totalorder %s920_s27, %s915_s16 }
  0x42   : > { %p924_p2 = scmp.lt.u32.totalorder %s915_s16, %s1229_s28 }
  0x43   : > { %p918_p3 = pnand %p917_p0, %p916_p13  ;;  %p923_p1 = por %p922_p9, %p921_p7 }
  0x45   : > { %p919_p5 = pneg %p918_p3  ;;  %p925_p4 = por %p924_p2, %p923_p1 }
  0x47   : > { %p926_p6 = pnand %p925_p4, %p919_p5 }
  0x49   : > { %929 = shalt.err (!%p926_p6)
}
  0x4a   : > { %s930_s10 = scalar_lea.vmem %s1236_s14, 384  ;;  %s1086_s7 = smov [#allocation2]  }
  0x4b   : > { %p931_p8 = scmp.ne.s32.totalorder %s1236_s14, %s930_s10  ;;  %s935_s17 = sshll.u32 %s1086_s7, 4  ;;  %s936_s17 = int_to_ptr.vmem [resolvable:$false] %s935_s17 }
  0x4c   : > { %s937_s23 = scalar_lea.vmem %s936_s17, 768  ;;  %p938_p3 = scmp.lt.s32.totalorder %s1236_s14, %s936_s17 }
  0x4d   : > { %p933_p10 = pnand %p931_p8, %p917_p0  ;;  %p939_p7 = scmp.lt.s32.totalorder %s937_s23, %s930_s10 }
  0x4f   : > { %p934_p13 = pneg %p933_p10  ;;  %p940_p9 = por %p939_p7, %p938_p3 }
  0x51   : > { %p941_p1 = pnand %p940_p9, %p934_p13 }
  0x53   : > { %944 = shalt.err (!%p941_p1)
}
  0x54   : > { %s1087_s16 = smov 128   ;;  %s1088_s27 = smov 8  }
  0x55   : > { %808 = dma.hbm_to_vmem [thread:$0]  (!%p1231_p11), %s1229_s28, 384, %s1236_s14, %s1238_s15, %s1087_s16, %s1087_s16, %s1088_s27  }
  0x56   : > { %s229_s29 = sand.u32 1, %s1081_s21   ;;  %s1275_s7 = scalar_lea.hbm %s1505_s1, %s734_s11 }
  0x57   : > { %s233_s17 = scalar_lea.vmem [#allocation5], %s1222_s12  ;;  %s1280_s0 = scalar_lea.sflag [#allocation6], %s229_s29 }
  0x58   : > { %s240_s23 = sshll.u32 %s233_s17, 4  ;;  %s945_s2 = scalar_lea.hbm %s1275_s7, 384  ;;  %s1278_s23 = int_to_ptr.vmem [resolvable:$true] %s240_s23 }
  0x59   : > { %p946_p5 = scmp.ne.s32.totalorder %s1275_s7, %s945_s2  ;;  %s950_s11 = scalar_lea.hbm %s1505_s1, 768 }
  0x5a   : > { %p951_p6 = scmp.lt.u32.totalorder %s1275_s7, %s1505_s1  ;;  %p952_p8 = scmp.lt.u32.totalorder %s950_s11, %s945_s2 }
  0x5b   : > { %p948_p2 = pnand %p946_p5, %p917_p0  ;;  %p954_p13 = scmp.lt.u32.totalorder %s945_s2, %s1275_s7 }
  0x5c   : > { %p953_p10 = por %p952_p8, %p951_p6 }
  0x5d   : > { %p949_p4 = pneg %p948_p2 }
  0x5e   : > { %p955_p3 = por %p954_p13, %p953_p10 }
  0x60   : > { %p956_p7 = pnand %p955_p3, %p949_p4 }
  0x62   : > { %959 = shalt.err (!%p956_p7)
}
  0x63   : > { %s960_s12 = scalar_lea.vmem %s1278_s23, 384  ;;  %s1089_s29 = smov [#allocation5]  }
  0x64   : > { %p961_p9 = scmp.ne.s32.totalorder %s1278_s23, %s960_s12  ;;  %s965_s10 = sshll.u32 %s1089_s29, 4  ;;  %s966_s10 = int_to_ptr.vmem [resolvable:$false] %s965_s10 }
  0x65   : > { %s967_s17 = scalar_lea.vmem %s966_s10, 768  ;;  %p968_p2 = scmp.lt.s32.totalorder %s1278_s23, %s966_s10 }
  0x66   : > { %p963_p1 = pnand %p961_p9, %p917_p0  ;;  %p969_p6 = scmp.lt.s32.totalorder %s967_s17, %s960_s12 }
  0x68   : > { %p964_p5 = pneg %p963_p1  ;;  %p970_p8 = por %p969_p6, %p968_p2 }
  0x6a   : > { %p971_p10 = pnand %p970_p8, %p964_p5 }
  0x6c   : > { %974 = shalt.err (!%p971_p10)
}
  0x6d   : > { %811 = dma.hbm_to_vmem [thread:$0]  (!%p1231_p11), %s1275_s7, 384, %s1278_s23, %s1280_s0, %s1087_s16, %s1087_s16, %s1088_s27  }
  0x6e   : > { %p1524_p0 = scmp.ne.s32.totalorder %s1517_s26, 0 }
  0x6f   : > { %s1312_s2 = sand.u32 (!%p1524_p0), 1, %s1073_s19   ;;  %p1525_p4 = scmp.ne.s32.totalorder (!%p1524_p0), %s1515_s24, 0 }
  0x70   : > { %252 = sbr.rel (%p1524_p0) target bundleno = 454 (0x1c6), region = 36  ;;  %s255_s6 = scalar_lea.sflag (!%p1524_p0), [#allocation3], %s1312_s2 }
  0x71   : > { %s1315_s28 = smul.u32 (!%p1524_p0), 24, %s1312_s2 }
  0x73   : > { %s1319_s14 = scalar_lea.vmem (!%p1524_p0), [#allocation2], %s1315_s28 }
  0x77   : > { %1048 = dma.done.wait (%p1525_p4), %s255_s6, 384  }
  0x78   : > { %1050 = vsyncadd (%p1525_p4), %s255_s6, 4294966912  ;;  %s263_s0 = sand.u32 1, %s1146_s22   ;;  %s1327_s16 = scalar_lea.vmem [#allocation5], %s1315_s28 }
  0x79   : > { %s264_s26 = scalar_lea.sflag [#allocation6], %s263_s0 }
  0x7a   : > { %1052 = dma.done.wait (%p1525_p4), %s264_s26, 384  }
  0x7b   : > { %1054 = vsyncadd (%p1525_p4), %s264_s26, 4294966912  ;;  %p1526_p11 = scmp.eq.s32.totalorder %s1146_s22, 0 }
  0x7d   : > { %1056 = dma.done.wait (%p1526_p11), [#allocation6], 4096   ;;  %p1527_p13 = pmov %p1526_p11 }
  0x7e   : > { %v1090_v0 = vmov 0.0   ;;  %v322_v1 = vld [vmem:[#allocation7 + $0x8] sm:$0xff]  ;;  %v324_v2 = vld [vmem:[#allocation7 + $0x18] sm:$0xff]  ;;  %v321_v3 = vld [vmem:[#allocation7] sm:$0xff]  ;;  %v355_v58 = vlaneseq  ;;  %s1400_s7 = scalar_lea.vmem [#allocation8], %s1315_s28  ;;  %s736_s11 = smul.u32 384, %s1146_s22 }
  0x7f   : > { %1058 = vsyncadd (%p1527_p13), [#allocation6], 4294963200  ;;  %429 = vmatprep.mubr.f32.mxu0 %v1090_v0  ;;  %435 = vmatprep.mubr.f32.mxu1 %v1090_v0  ;;  %v738_v4 = vpack.c.bf16 %v324_v2, %v322_v1  ;;  %v323_v5 = vld [vmem:[#allocation7 + $0x10] sm:$0xff]  ;;  %v326_v6 = vld [vmem:[#allocation7 + $0x28] sm:$0xff]  ;;  %s569_s23 = sshll.u32 %s1400_s7, 4  ;;  %s1412_s15 = scalar_lea.vmem [#allocation9], %s1315_s28  ;;  %s1409_s23 = int_to_ptr.vmem [resolvable:$true] %s569_s23 }
  0x80   : > { %v328_v7 = vld [vmem:[#allocation7 + $0x38] sm:$0xff]  ;;  %v740_v8 = vpack.c.bf16 %v323_v5, %v321_v3  ;;  %v325_v10 = vld [vmem:[#allocation7 + $0x20] sm:$0xff]  ;;  %v327_v11 = vld [vmem:[#allocation7 + $0x30] sm:$0xff]  ;;  %v356_v59 = vshrl.u32 %v355_v58, 7  ;;  %s585_s13 = sshll.u32 %s1412_s15, 4  ;;  %s1421_s29 = scalar_lea.hbm %s1508_s4, %s736_s11  ;;  %s1423_s13 = int_to_ptr.vmem [resolvable:$true] %s585_s13 }
  0x81   : > { %v742_v9 = vpack.c.bf16 %v328_v7, %v326_v6  ;;  %v330_v12 = vld [vmem:[#allocation7 + $0x48] sm:$0xff]  ;;  %739 = vmatprep.subr.bf16.mxu0 %v738_v4  ;;  %770 = vmatprep.subr.bf16.mxu1 %v738_v4  ;;  %v332_v13 = vld [vmem:[#allocation7 + $0x58] sm:$0xff]  ;;  %v744_v14 = vpack.c.bf16 %v327_v11, %v325_v10  ;;  %v329_v16 = vld [vmem:[#allocation7 + $0x40] sm:$0xff]  ;;  %s1429_s28 = scalar_lea.hbm %s1509_s5, %s736_s11  ;;  %s551_s6 = scalar_lea.sflag [#allocation4], %s1312_s2 }
  0x82   : > { %741 = vmatpush1.bf16.msra.mxu0 %v740_v8  ;;  %778 = vmatpush1.bf16.msra.mxu1 %v740_v8  ;;  %v746_v15 = vpack.c.bf16 %v332_v13, %v330_v12  ;;  %v331_v17 = vld [vmem:[#allocation7 + $0x50] sm:$0xff]  ;;  %v334_v18 = vld [vmem:[#allocation7 + $0x68] sm:$0xff]  ;;  %v336_v19 = vld [vmem:[#allocation7 + $0x78] sm:$0xff]  ;;  %v357_v60 = vsub.s32 0, %v356_v59  ;;  %v361_v62 = vsub.s32 1, %v356_v59  ;;  %s1091_s0 = smov [#allocation8]  }
  0x83   : > { %743 = vmatprep.subr.bf16.mxu0 %v742_v9  ;;  %771 = vmatprep.subr.bf16.mxu1 %v742_v9  ;;  %v748_v20 = vpack.c.bf16 %v331_v17, %v329_v16  ;;  %v750_v21 = vpack.c.bf16 %v336_v19, %v334_v18  ;;  %v333_v22 = vld [vmem:[#allocation7 + $0x60] sm:$0xff]  ;;  %v335_v23 = vld [vmem:[#allocation7 + $0x70] sm:$0xff]  ;;  %v338_v24 = vld [vmem:[#allocation7 + $0x88] sm:$0xff]  ;;  %s979_s26 = sshll.u32 %s1091_s0, 4  ;;  %s980_s26 = int_to_ptr.vmem [resolvable:$false] %s979_s26 }
  0x84   : > { %v340_v25 = vld [vmem:[#allocation7 + $0x98] sm:$0xff]  ;;  %v752_v26 = vpack.c.bf16 %v335_v23, %v333_v22  ;;  %v337_v28 = vld [vmem:[#allocation7 + $0x80] sm:$0xff]  ;;  %v339_v29 = vld [vmem:[#allocation7 + $0x90] sm:$0xff]  ;;  %p982_p1 = scmp.lt.s32.totalorder %s1409_s23, %s980_s26 }
  0x85   : > { %v754_v27 = vpack.c.bf16 %v340_v25, %v338_v24  ;;  %v342_v30 = vld [vmem:[#allocation7 + $0xa8] sm:$0xff]  ;;  %v344_v31 = vld [vmem:[#allocation7 + $0xb8] sm:$0xff]  ;;  %v756_v32 = vpack.c.bf16 %v339_v29, %v337_v28  ;;  %v341_v34 = vld [vmem:[#allocation7 + $0xa0] sm:$0xff] }
  0x86   : > { %745 = vmatpush1.bf16.msra.mxu0 %v744_v14  ;;  %779 = vmatpush1.bf16.msra.mxu1 %v744_v14  ;;  %v758_v33 = vpack.c.bf16 %v344_v31, %v342_v30  ;;  %v343_v35 = vld [vmem:[#allocation7 + $0xb0] sm:$0xff]  ;;  %v346_v36 = vld [vmem:[#allocation7 + $0xc8] sm:$0xff]  ;;  %v348_v37 = vld [vmem:[#allocation7 + $0xd8] sm:$0xff] }
  0x87   : > { %747 = vmatprep.subr.bf16.mxu0 %v746_v15  ;;  %772 = vmatprep.subr.bf16.mxu1 %v746_v15  ;;  %v760_v38 = vpack.c.bf16 %v343_v35, %v341_v34  ;;  %v762_v39 = vpack.c.bf16 %v348_v37, %v346_v36  ;;  %v345_v40 = vld [vmem:[#allocation7 + $0xc0] sm:$0xff]  ;;  %v347_v41 = vld [vmem:[#allocation7 + $0xd0] sm:$0xff]  ;;  %v350_v42 = vld [vmem:[#allocation7 + $0xe8] sm:$0xff] }
  0x88   : > { %v352_v43 = vld [vmem:[#allocation7 + $0xf8] sm:$0xff]  ;;  %v764_v44 = vpack.c.bf16 %v347_v41, %v345_v40  ;;  %v349_v46 = vld [vmem:[#allocation7 + $0xe0] sm:$0xff]  ;;  %v351_v47 = vld [vmem:[#allocation7 + $0xf0] sm:$0xff] }
  0x89   : > { %v766_v45 = vpack.c.bf16 %v352_v43, %v350_v42  ;;  %v312_v48 = vld [vmem:[%s1319_s14] sm:$0xff]  ;;  %v768_v49 = vpack.c.bf16 %v351_v47, %v349_v46  ;;  %v315_v50 = vld [vmem:[%s1327_s16] sm:$0xff]  ;;  %v313_v51 = vld [vmem:[%s1319_s14 + $0x8] sm:$0xff] }
  0x8a   : > { %749 = vmatpush1.bf16.msra.mxu0 %v748_v20  ;;  %780 = vmatpush1.bf16.msra.mxu1 %v748_v20  ;;  %v316_v52 = vld [vmem:[%s1327_s16 + $0x8] sm:$0xff]  ;;  %v318_v53 = vsub.f32 %v312_v48, %v315_v50  ;;  %v314_v55 = vld [vmem:[%s1319_s14 + $0x10] sm:$0xff]  ;;  %v317_v56 = vld [vmem:[%s1327_s16 + $0x10] sm:$0xff]  ;;  %s975_s14 = scalar_lea.vmem %s1409_s23, 384  ;;  %s981_s16 = scalar_lea.vmem %s980_s26, 768 }
  0x8b   : > { %751 = vmatprep.subr.bf16.mxu0 %v750_v21  ;;  %773 = vmatprep.subr.bf16.mxu1 %v750_v21  ;;  %v319_v54 = vsub.f32 %v313_v51, %v316_v52  ;;  %v320_v57 = vsub.f32 %v314_v55, %v317_v56  ;;  %v353_v61 = vld [vmem:[%s1507_s3] sm:$0x3]  ;;  %p976_p3 = scmp.ne.s32.totalorder %s1409_s23, %s975_s14  ;;  %p983_p5 = scmp.lt.s32.totalorder %s981_s16, %s975_s14 }
  0x8c   : > { %v358_v63 = vrot.slane %v353_v61, %v357_v60  ;;  %v362_v1 = vrot.slane %v353_v61, %v361_v62 }
  0x8d   : > { %p977_p7 = pnand %p976_p3, %p1216_p12  ;;  %p984_p2 = por %p983_p5, %p982_p1 }
  0x8e   : > { %753 = vmatpush1.bf16.msra.mxu0 %v752_v26  ;;  %781 = vmatpush1.bf16.msra.mxu1 %v752_v26 }
  0x8f   : > { %755 = vmatprep.subr.bf16.mxu0 %v754_v27  ;;  %774 = vmatprep.subr.bf16.mxu1 %v754_v27  ;;  %p978_p9 = pneg %p977_p7 }
  0x91   : > { %p985_p6 = pnand %p984_p2, %p978_p9 }
  0x92   : > { %757 = vmatpush1.bf16.msra.mxu0 %v756_v32  ;;  %782 = vmatpush1.bf16.msra.mxu1 %v756_v32 }
  0x93   : > { %759 = vmatprep.subr.bf16.mxu0 %v758_v33  ;;  %775 = vmatprep.subr.bf16.mxu1 %v758_v33 }
  0x96   : > { %761 = vmatpush1.bf16.msra.mxu0 %v760_v38  ;;  %783 = vmatpush1.bf16.msra.mxu1 %v760_v38 }
  0x97   : > { %763 = vmatprep.subr.bf16.mxu0 %v762_v39  ;;  %776 = vmatprep.subr.bf16.mxu1 %v762_v39 }
  0x9a   : > { %765 = vmatpush1.bf16.msra.mxu0 %v764_v44  ;;  %784 = vmatpush1.bf16.msra.mxu1 %v764_v44 }
  0x9b   : > { %767 = vmatprep.subr.bf16.mxu0 %v766_v45  ;;  %777 = vmatprep.subr.bf16.mxu1 %v766_v45 }
  0x9e   : > { %769 = vmatpush1.bf16.msra.mxu0 %v768_v49  ;;  %785 = vmatpush1.bf16.msra.mxu1 %v768_v49 }
  0xa1   : > { %430 = vmatmul.mubr.f32.vlgmr.msra.gmra.mrb[0].mxu0 %v318_v53  ;;  %436 = vmatmul.mubr.f32.vlgmr.msra.gmra.mrb[0].mxu1 %v319_v54 }
  0xa2   : > { %441 = vmatprep.mubr.f32.mxu1 %v1090_v0 }
  0xa5   : > { %442 = vmatmul.mubr.f32.gmra.mrb[2].mxu1 %v320_v57 }
 0x174   : > { %v431_v2 = vpop.f32.mrb[0].mxu0  ;;  %v437_v3 = vpop.f32.mrb[0].mxu1 }
 0x175   : > { %v1349_v4 = vadd.f32 %v431_v2, %v358_v63  ;;  %v1351_v5 = vadd.f32 %v437_v3, %v358_v63  ;;  %v433_v6 = vpop.f32.mrb[1].mxu0  ;;  %v439_v7 = vpop.f32.mrb[1].mxu1 }
 0x176   : > { %v1353_v0 = vadd.f32 %v433_v6, %v362_v1  ;;  %v1355_v8 = vadd.f32 %v439_v7, %v362_v1 }
 0x177   : > { %v454_v9 = vand.u32 2147483647, %v1349_v4  ;;  %v456_v10 = vand.u32 2147483647, %v1351_v5  ;;  %v448_v52 = vmax.f32 %v1349_v4, 0.0  ;;  %v450_v53 = vmax.f32 %v1351_v5, 0.0 }
 0x178   : > { %v455_v11 = vand.u32 2147483647, %v1353_v0  ;;  %v457_v12 = vand.u32 2147483647, %v1355_v8  ;;  %v443_v15 = vpop.f32.mrb[2].mxu1  ;;  %v449_v58 = vmax.f32 %v1353_v0, 0.0 }
 0x179   : > { %v460_v13 = vsub.f32 0.0, %v454_v9  ;;  %v462_v14 = vsub.f32 0.0, %v456_v10  ;;  %v1361_v18 = vadd.f32 %v443_v15, %v358_v63  ;;  %v445_v19 = vpop.f32.mrb[3].mxu1  ;;  %v451_v59 = vmax.f32 %v1355_v8, 0.0 }
 0x17a   : > { %v461_v16 = vsub.f32 0.0, %v455_v11  ;;  %v463_v17 = vsub.f32 0.0, %v457_v12  ;;  %v1363_v22 = vadd.f32 %v445_v19, %v362_v1 }
 0x17b   : > { %v466_v20 = vmul.f32 1.442695, %v460_v13  ;;  %v470_v21 = vmul.f32 1.442695, %v462_v14  ;;  %v458_v25 = vand.u32 2147483647, %v1361_v18 }
 0x17c   : > { %v468_v23 = vmul.f32 1.442695, %v461_v16  ;;  %v472_v24 = vmul.f32 1.442695, %v463_v17  ;;  %v459_v26 = vand.u32 2147483647, %v1363_v22 }
 0x17d   : > { %863 = vpow2.f32 %v466_v20  ;;  %v464_v27 = vsub.f32 0.0, %v458_v25 }
 0x17e   : > { %865 = vpow2.f32 %v470_v21  ;;  %v465_v28 = vsub.f32 0.0, %v459_v26 }
 0x17f   : > { %867 = vpow2.f32 %v468_v23  ;;  %v474_v29 = vmul.f32 1.442695, %v464_v27 }
 0x180   : > { %869 = vpow2.f32 %v472_v24  ;;  %v476_v30 = vmul.f32 1.442695, %v465_v28 }
 0x181   : > { %871 = vpow2.f32 %v474_v29 }
 0x182   : > { %873 = vpow2.f32 %v476_v30 }
 0x187   : > { %v864_v31 = vpop.eup %863 }
 0x188   : > { %v866_v32 = vpop.eup %865  ;;  %v478_v33 = vadd.f32 1.0, %v864_v31  ;;  %v481_v40 = vmul.f32 -0.5, %v864_v31  ;;  %v484_v45 = vand.u32 2147483647, %v864_v31 }
 0x189   : > { %v868_v34 = vpop.eup %867  ;;  %v496_v35 = vadd.f32 1.0, %v866_v32  ;;  %v499_v42 = vmul.f32 -0.5, %v866_v32  ;;  %v502_v49 = vand.u32 2147483647, %v866_v32 }
 0x18a   : > { %v870_v36 = vpop.eup %869  ;;  %875 = vlog2.f32 %v478_v33  ;;  %v487_v37 = vadd.f32 1.0, %v868_v34  ;;  %v490_v44 = vmul.f32 -0.5, %v868_v34  ;;  %v482_v48 = vadd.f32 1.0, %v481_v40 }
 0x18b   : > { %877 = vlog2.f32 %v496_v35  ;;  %v505_v38 = vadd.f32 1.0, %v870_v36  ;;  %v1367_v39 = vpop.eup %871  ;;  %v508_v46 = vmul.f32 -0.5, %v870_v36  ;;  %v500_v50 = vadd.f32 1.0, %v499_v42 }
 0x18c   : > { %879 = vlog2.f32 %v487_v37  ;;  %v1369_v41 = vpop.eup %873  ;;  %v514_v43 = vadd.f32 1.0, %v1367_v39  ;;  %v493_v51 = vand.u32 2147483647, %v868_v34  ;;  %v491_v54 = vadd.f32 1.0, %v490_v44 }
 0x18d   : > { %881 = vlog2.f32 %v505_v38  ;;  %v523_v47 = vadd.f32 1.0, %v1369_v41  ;;  %v517_v55 = vmul.f32 -0.5, %v1367_v39  ;;  %vm1376_vm0 = vcmp.lt.f32.partialorder %v484_v45, 0.0004427343 }
 0x18e   : > { %883 = vlog2.f32 %v514_v43  ;;  %v509_v60 = vadd.f32 1.0, %v508_v46  ;;  %v483_v63 = vmul.f32 %v864_v31, %v482_v48  ;;  %vm1382_vm1 = vcmp.lt.f32.partialorder %v502_v49, 0.0004427343 }
 0x18f   : > { %885 = vlog2.f32 %v523_v47  ;;  %v526_v2 = vmul.f32 -0.5, %v1369_v41  ;;  %v501_v5 = vmul.f32 %v866_v32, %v500_v50  ;;  %vm1387_vm2 = vcmp.lt.f32.partialorder %v493_v51, 0.0004427343 }
 0x190   : > { %v511_v7 = vand.u32 2147483647, %v870_v36  ;;  %v492_v9 = vmul.f32 %v868_v34, %v491_v54  ;;  %v518_v10 = vadd.f32 1.0, %v517_v55  ;;  %v510_v14 = vmul.f32 %v870_v36, %v509_v60 }
 0x191   : > { %v520_v15 = vand.u32 2147483647, %v1367_v39  ;;  %v527_v20 = vadd.f32 1.0, %v526_v2  ;;  %v529_v25 = vand.u32 2147483647, %v1369_v41  ;;  %v452_v33 = vmax.f32 %v1361_v18, 0.0 }
 0x192   : > { %vm512_vm3 = vcmp.lt.f32.partialorder %v511_v7, 0.0004427343  ;;  %v519_v29 = vmul.f32 %v1367_v39, %v518_v10  ;;  %v453_v38 = vmax.f32 %v1363_v22, 0.0 }
 0x193   : > { %vm521_vm4 = vcmp.lt.f32.partialorder %v520_v15, 0.0004427343  ;;  %v528_v36 = vmul.f32 %v1369_v41, %v527_v20  ;;  %vm530_vm5 = vcmp.lt.f32.partialorder %v529_v25, 0.0004427343 }
 0x194   : > { %v876_v56 = vpop.eup %875 }
 0x195   : > { %v878_v61 = vpop.eup %877  ;;  %v480_v62 = vmul.f32 0.6931472, %v876_v56 }
 0x196   : > { %v880_v3 = vpop.eup %879  ;;  %v498_v4 = vmul.f32 0.6931472, %v878_v61 }
 0x197   : > { %v486_v0 = vsel %vm1376_vm0, %v483_v63, %v480_v62  ;;  %v489_v8 = vmul.f32 0.6931472, %v880_v3  ;;  %v882_v11 = vpop.eup %881 }
 0x198   : > { %v532_v12 = vadd.f32 %v486_v0, %v448_v52  ;;  %v504_v13 = vsel %vm1382_vm1, %v501_v5, %v498_v4  ;;  %v507_v19 = vmul.f32 0.6931472, %v882_v11  ;;  %v884_v21 = vpop.eup %883 }
 0x199   : > { %v534_v16 = vadd.f32 %v504_v13, %v450_v53  ;;  %v495_v17 = vsel %vm1387_vm2, %v492_v9, %v489_v8  ;;  %v516_v28 = vmul.f32 0.6931472, %v884_v21  ;;  %v886_v30 = vpop.eup %885 }
 0x19a   : > { %v538_v23 = vadd.f32 0.0001, %v532_v12  ;;  %v533_v24 = vadd.f32 %v495_v17, %v449_v58  ;;  %v513_v27 = vsel %vm512_vm3, %v510_v14, %v507_v19  ;;  %v525_v35 = vmul.f32 0.6931472, %v886_v30 }
 0x19b   : > { %v540_v26 = vadd.f32 0.0001, %v534_v16  ;;  %v535_v32 = vadd.f32 %v513_v27, %v451_v59  ;;  %v522_v34 = vsel %vm521_vm4, %v519_v29, %v516_v28 }
 0x19c   : > { %544 = vst [vmem:[%s1400_s7] sm:$0xff] %v538_v23  ;;  %v539_v31 = vadd.f32 0.0001, %v533_v24  ;;  %v536_v37 = vadd.f32 %v522_v34, %v452_v33  ;;  %v531_v39 = vsel %vm530_vm5, %v528_v36, %v525_v35 }
 0x19d   : > { %545 = vst [vmem:[%s1400_s7 + $0x8] sm:$0xff] %v540_v26  ;;  %v541_v18 = vadd.f32 0.0001, %v535_v32  ;;  %v537_v41 = vadd.f32 %v531_v39, %v453_v38 }
 0x19e   : > { %547 = vst [vmem:[%s1412_s15] sm:$0xff] %v539_v31  ;;  %v542_v40 = vadd.f32 0.0001, %v536_v37 }
 0x19f   : > { %548 = vst [vmem:[%s1412_s15 + $0x8] sm:$0xff] %v541_v18  ;;  %v543_v42 = vadd.f32 0.0001, %v537_v41 }
 0x1a0   : > { %546 = vst [vmem:[%s1400_s7 + $0x10] sm:$0xff] %v542_v40 }
 0x1a1   : > { %988 = shalt.err (!%p985_p6)
}
 0x1a2   : > { %s989_s24 = scalar_lea.hbm %s1421_s29, 384  ;;  %s993_s11 = scalar_lea.hbm %s1508_s4, 768 }
 0x1a3   : > { %p990_p8 = scmp.ne.s32.totalorder %s1421_s29, %s989_s24  ;;  %p994_p4 = scmp.lt.u32.totalorder %s1421_s29, %s1508_s4 }
 0x1a4   : > { %p995_p11 = scmp.lt.u32.totalorder %s993_s11, %s989_s24  ;;  %p997_p3 = scmp.lt.u32.totalorder %s989_s24, %s1421_s29 }
 0x1a5   : > { %p991_p10 = pnand %p990_p8, %p1216_p12 }
 0x1a6   : > { %p996_p13 = por %p995_p11, %p994_p4 }
 0x1a7   : > { %p992_p0 = pneg %p991_p10 }
 0x1a8   : > { %p998_p7 = por %p997_p3, %p996_p13 }
 0x1aa   : > { %p999_p9 = pnand %p998_p7, %p992_p0 }
 0x1ac   : > { %1002 = shalt.err (!%p999_p9)
}
 0x1ad   : > { %s1092_s10 = smov 128   ;;  %s1093_s17 = smov 8   ;;  %549 = vst [vmem:[%s1412_s15 + $0x10] sm:$0xff] %v543_v42 }
 0x1ae   : > { %797 = dma.vmem_to_hbm [thread:$0]  (%p1216_p12), %s1409_s23, 384, %s1421_s29, %s551_s6, %s1092_s10, %s1092_s10, %s1093_s17  }
 0x1af   : > { %s556_s14 = scalar_lea.sflag [#allocation10], %s1312_s2  ;;  %s1003_s0 = scalar_lea.vmem %s1423_s13, 384 }
 0x1b0   : > { %p1004_p1 = scmp.ne.s32.totalorder %s1423_s13, %s1003_s0  ;;  %s1094_s26 = smov [#allocation9]  }
 0x1b1   : > { %s1007_s16 = sshll.u32 %s1094_s26, 4  ;;  %s1008_s16 = int_to_ptr.vmem [resolvable:$false] %s1007_s16 }
 0x1b2   : > { %p1005_p5 = pnand %p1004_p1, %p1216_p12  ;;  %s1009_s24 = scalar_lea.vmem %s1008_s16, 768 }
 0x1b3   : > { %p1010_p6 = scmp.lt.s32.totalorder %s1423_s13, %s1008_s16  ;;  %p1011_p8 = scmp.lt.s32.totalorder %s1009_s24, %s1003_s0 }
 0x1b4   : > { %p1006_p2 = pneg %p1005_p5 }
 0x1b5   : > { %p1012_p10 = por %p1011_p8, %p1010_p6 }
 0x1b7   : > { %p1013_p0 = pnand %p1012_p10, %p1006_p2 }
 0x1b9   : > { %1016 = shalt.err (!%p1013_p0)
}
 0x1ba   : > { %s1017_s23 = scalar_lea.hbm %s1429_s28, 384  ;;  %s1021_s6 = scalar_lea.hbm %s1509_s5, 768 }
 0x1bb   : > { %p1018_p4 = scmp.ne.s32.totalorder %s1429_s28, %s1017_s23  ;;  %p1022_p3 = scmp.lt.u32.totalorder %s1429_s28, %s1509_s5 }
 0x1bc   : > { %p1023_p7 = scmp.lt.u32.totalorder %s1021_s6, %s1017_s23  ;;  %p1025_p1 = scmp.lt.u32.totalorder %s1017_s23, %s1429_s28 }
 0x1bd   : > { %p1019_p11 = pnand %p1018_p4, %p1216_p12 }
 0x1be   : > { %p1024_p9 = por %p1023_p7, %p1022_p3 }
 0x1bf   : > { %p1020_p13 = pneg %p1019_p11 }
 0x1c0   : > { %p1026_p5 = por %p1025_p1, %p1024_p9 }
 0x1c2   : > { %p1027_p2 = pnand %p1026_p5, %p1020_p13 }
 0x1c4   : > { %1030 = shalt.err (!%p1027_p2)
}
 0x1c5   : > { %798 = dma.vmem_to_hbm [thread:$0]  (%p1216_p12), %s1423_s13, 384, %s1429_s28, %s556_s14, %s1092_s10, %s1092_s10, %s1093_s17  }
 0x1c6 PF: > { %s600_s11 = sand.u32 1, %s1069_s18   ;;  %p1534_p6 = scmp.ne.s32.totalorder %s1516_s25, 0 }
 0x1c7   : > { %p1535_p8 = scmp.ge.s32.totalorder %s1081_s21, 2  ;;  %s601_s22 = scalar_lea.sflag [#allocation4], %s600_s11 }
 0x1c9   : > { %p813_p10 = pnand %p1535_p8, %p1534_p6 }
 0x1cb   : > { %1060 = dma.done.wait (!%p813_p10), %s601_s22, 384  }
 0x1cc   : > { %1062 = vsyncadd (!%p813_p10), %s601_s22, 4294966912  ;;  %s610_s9 = scalar_lea.sflag [#allocation10], %s600_s11 }
 0x1cd   : > { %1064 = dma.done.wait (!%p813_p10), %s610_s9, 384  }
 0x1ce   : > { %1066 = vsyncadd (!%p813_p10), %s610_s9, 4294966912  ;;  %p25_p12 = scmp.ge.s32.totalorder %s1181_s30, 4   ;;  %s1536_s18 = smov %s1073_s19 }
 0x1cf   : > { %s1537_s19 = smov %s1077_s20  ;;  %s1538_s20 = smov %s1212_s8 }
 0x1d0   : > { %s1539_s21 = smov %s1181_s30  ;;  %27 = sbr.rel (!%p25_p12) target bundleno = 12 (0xc), region = 115 }
 0x1d7   :  { %615 = vsyncpa [#allocation3], 1 }
 0x1d8   :  { %617 = vsyncpa [#allocation3 + $0x1], 1 }
 0x1d9   :  { %618 = vsyncpa [#allocation6], 1 }
 0x1da   :  { %620 = vsyncpa [#allocation6 + $0x1], 1 }
 0x1db   :  { %621 = vsyncpa [#allocation4], 1 }
 0x1dc   :  { %623 = vsyncpa [#allocation4 + $0x1], 1 }
 0x1dd   :  { %624 = vsyncpa [#allocation10], 1 }
 0x1de   :  { %626 = vsyncpa [#allocation10 + $0x1], 1 }

</bundles_post_ra>
